<compile_context>
chip_gen: v7x
topology: tpu7x:2x2x1
jax: 0.10.0
libtpu: 0.0.40
codegen_flags: <defaults>
</compile_context>

<pallas_src>
import functools

import jax
import jax.numpy as jnp
from jax.experimental import pallas as pl
from jax.experimental.pallas import tpu as pltpu

_LANES = 128
_SUBLANES = 8
_NACC = 8                               # independent (8,128) accumulators
_TARGET_BLOCK_BYTES = 2 * 1024 * 1024   # HBM bytes per input per grid step


def _cdiv(a, b):
    return -(-a // b)


def _mse_sum_kernel(pred_ref, tgt_ref, out_ref, acc_ref, *,
                    rows_valid, block_rows, needs_mask, inv_n):
    # All program_id / num_programs uses stay at the top level of the kernel
    # body (never inside a pl.when body) so lowering is clean everywhere.
    k = pl.program_id(0)
    is_first = k == 0
    is_last = k == pl.num_programs(0) - 1

    @pl.when(is_first)
    def _():
        acc_ref[...] = jnp.zeros_like(acc_ref)

    p = pred_ref[...].astype(jnp.float32)
    t = tgt_ref[...].astype(jnp.float32)
    d = p - t
    sq = d * d

    if needs_mask:
        # The final grid step's block overhangs the array edge: rows at global
        # index >= rows_valid hold unspecified data; zero them before summing.
        row = jax.lax.broadcasted_iota(jnp.int32, sq.shape, 0)
        limit = rows_valid - k * block_rows
        sq = jnp.where(row < limit, sq, jnp.float32(0.0))

    # Round-robin the per-vreg partial sums across _NACC independent
    # accumulators (pure VPU adds; the single cross-lane reduce is in the
    # epilogue).  Static Python dispatch on the (static) block shape.
    if block_rows % (_NACC * _SUBLANES) == 0:
        acc_ref[...] += jnp.sum(
            sq.reshape(-1, _NACC, _SUBLANES, _LANES), axis=0)
    elif block_rows % _SUBLANES == 0:
        acc_ref[0, :, :] += jnp.sum(
            sq.reshape(-1, _SUBLANES, _LANES), axis=0)
    else:
        # Tiny single-block case with an odd row count.
        acc_ref[0, 0:1, :] += jnp.sum(sq, axis=0, keepdims=True)

    @pl.when(is_last)
    def _():
        total = jnp.sum(acc_ref[...]) * inv_n   # single XLU reduce, once
        out_ref[...] = jnp.full(out_ref.shape, total, out_ref.dtype)


def mse_regularized(predictions, target, W=None, *, rtype="fro", rweight=0.0):
    """Pallas implementation of MSE_regularized.forward."""
    assert predictions.shape == target.shape
    if rtype not in ("fro", "none"):
        # TODO(synk): other matrix-norm orders (nuclear / spectral need an SVD)
        # have no clean Pallas equivalent; only 'fro' and 'none' are supported.
        raise NotImplementedError(f"rtype={rtype!r} not supported")

    n = predictions.size
    itemsize = jnp.dtype(predictions.dtype).itemsize

    # Flatten row-major (free metadata reshape of a contiguous array).
    flat_p = predictions.reshape(-1)
    flat_t = target.reshape(-1)
    rem = n % _LANES
    if rem:
        # TODO(synk): lane-misaligned n still costs one minimal pad copy; a
        # fully copy-free path needs manual 1-D DMA blocks or input fusion.
        pad = _LANES - rem
        flat_p = jnp.pad(flat_p, (0, pad))
        flat_t = jnp.pad(flat_t, (0, pad))

    rows = flat_p.size // _LANES            # == cdiv(n, 128)

    # Byte-based block sizing: ~2 MiB of HBM traffic per input per grid step
    # (f32 -> 4096 rows, bf16 -> 8192 rows); double-buffered VMEM stays small.
    target_rows = max(_NACC * _SUBLANES,
                      _TARGET_BLOCK_BYTES // (_LANES * itemsize))
    target_rows -= target_rows % (_NACC * _SUBLANES)
    if rows <= target_rows:
        block_rows, steps = rows, 1         # full-dim block (no alignment req)
    else:
        block_rows, steps = target_rows, _cdiv(rows, target_rows)
    needs_mask = (rows % block_rows) != 0   # partial final block -> in-kernel mask

    pred2d = flat_p.reshape(rows, _LANES)
    tgt2d = flat_t.reshape(rows, _LANES)

    kernel = functools.partial(
        _mse_sum_kernel, rows_valid=rows, block_rows=block_rows,
        needs_mask=needs_mask, inv_n=1.0 / n)

    data_spec = pl.BlockSpec((block_rows, _LANES), lambda k: (k, 0))

    part = pl.pallas_call(
        kernel,
        out_shape=jax.ShapeDtypeStruct((_SUBLANES, _LANES), jnp.float32),
        grid_spec=pltpu.PrefetchScalarGridSpec(
            num_scalar_prefetch=0,
            grid=(steps,),
            in_specs=[data_spec, data_spec],
            out_specs=pl.BlockSpec((_SUBLANES, _LANES), lambda k: (0, 0)),
            scratch_shapes=[
                pltpu.VMEM((_NACC, _SUBLANES, _LANES), jnp.float32)],
        ),
        compiler_params=pltpu.CompilerParams(
            dimension_semantics=("arbitrary",),
            vmem_limit_bytes=32 * 1024 * 1024,
        ),
        cost_estimate=pl.CostEstimate(
            flops=3 * n, transcendentals=0,
            bytes_accessed=2 * n * itemsize + _SUBLANES * _LANES * 4),
    )(pred2d, tgt2d)

    mse = part[0, 0]

    if rtype == "none":
        return mse

    assert W is not None and W.ndim == 2, "matrix_norm expects a 2-D W"
    # Frobenius term as a tiny read-once XLA reduce (per perf review): keeps W
    # and its double-buffer out of kernel VMEM on every generation.
    w = W.astype(jnp.float32)
    reg = jnp.sqrt(jnp.sum(w * w))
    return mse + jnp.float32(rweight) * reg


if __name__ == "__main__":
    key = jax.random.PRNGKey(0)
    k1, k2, k3, k4, k5, k6, k7 = jax.random.split(key, 7)

    rweight = 0.01

    # Small NCHW case (single grid step, zero-copy input path).
    pred = jax.random.normal(k1, (2, 4, 16, 16), dtype=jnp.float32)
    tgt = jax.random.normal(k2, (2, 4, 16, 16), dtype=jnp.float32)
    W = jax.random.normal(k3, (16, 128), dtype=jnp.float32)

    loss = jax.block_until_ready(
        mse_regularized(pred, tgt, W, rtype="fro", rweight=rweight))
    ref = jnp.mean((pred - tgt) ** 2) + rweight * jnp.sqrt(jnp.sum(W * W))
    assert jnp.allclose(loss, ref, rtol=1e-5, atol=1e-5), (loss, ref)

    # rtype='none' path (pure MSE).
    loss_none = jax.block_until_ready(mse_regularized(pred, tgt, W, rtype="none"))
    ref_none = jnp.mean((pred - tgt) ** 2)
    assert jnp.allclose(loss_none, ref_none, rtol=1e-5, atol=1e-5)

    # Multi-step reduction grid with a partial (masked) final block.
    pred_l = jax.random.normal(k4, (8, 16, 96, 64), dtype=jnp.float32)
    tgt_l = jax.random.normal(k5, (8, 16, 96, 64), dtype=jnp.float32)
    loss_l = jax.block_until_ready(
        mse_regularized(pred_l, tgt_l, W, rtype="fro", rweight=rweight))
    ref_l = jnp.mean((pred_l - tgt_l) ** 2) + rweight * jnp.sqrt(jnp.sum(W * W))
    assert jnp.allclose(loss_l, ref_l, rtol=1e-4, atol=1e-5), (loss_l, ref_l)

    # Lane-misaligned element count: minimal-pad + odd-row-count branch.
    pred_p = jax.random.normal(k6, (2, 3, 5, 7), dtype=jnp.float32)
    tgt_p = jax.random.normal(k7, (2, 3, 5, 7), dtype=jnp.float32)
    loss_p = jax.block_until_ready(
        mse_regularized(pred_p, tgt_p, W, rtype="fro", rweight=rweight))
    ref_p = jnp.mean((pred_p - tgt_p) ** 2) + rweight * jnp.sqrt(jnp.sum(W * W))
    assert jnp.allclose(loss_p, ref_p, rtol=1e-5, atol=1e-5), (loss_p, ref_p)

    print("KERNEL_OK")
</pallas_src>

<mosaic_0001>
module attributes {stable_mosaic.version = 11 : i64} {
  func.func @_mse_sum_kernel(%arg0: i32, %arg1: memref<16x128xf32, #tpu.memory_space<vmem>>, %arg2: memref<16x128xf32, #tpu.memory_space<vmem>>, %arg3: memref<8x128xf32, #tpu.memory_space<vmem>>, %arg4: memref<8x8x128xf32, #tpu.memory_space<vmem>>) attributes {dimension_semantics = [#tpu.dimension_semantics<arbitrary>], iteration_bounds = array<i64: 1>, scalar_prefetch = 0 : i64, scratch_operands = 1 : i64, tpu.core_type = #tpu.core_type<tc>, window_params = [{transform_indices = @transform_0, window_bounds = array<i64: 16, 128>}, {transform_indices = @transform_1, window_bounds = array<i64: 16, 128>}, {pipeline_mode = #tpu.pipeline_mode<synchronous>, transform_indices = @transform_2, window_bounds = array<i64: 8, 128>}]} {
    %c0_i32 = arith.constant 0 : i32
    %0 = arith.cmpi eq, %arg0, %c0_i32 : i32
    %c0_i32_0 = arith.constant 0 : i32
    %1 = arith.cmpi eq, %arg0, %c0_i32_0 : i32
    %2 = arith.extui %0 : i1 to i32
    %c0_i32_1 = arith.constant 0 : i32
    %3 = arith.cmpi ne, %2, %c0_i32_1 : i32
    scf.if %3 {
      %cst_12 = arith.constant 0.000000e+00 : f32
      %18 = vector.broadcast %cst_12 : f32 to vector<8x8x128xf32>
      %c0_13 = arith.constant 0 : index
      %c0_14 = arith.constant 0 : index
      %c0_15 = arith.constant 0 : index
      %19 = vector.load %arg4[%c0_13, %c0_14, %c0_15] : memref<8x8x128xf32, #tpu.memory_space<vmem>>, vector<8x8x128xf32>
      tpu.vector_store %arg4[%c0_13, %c0_14, %c0_15], %18 {strides = array<i32>} : memref<8x8x128xf32, #tpu.memory_space<vmem>>, vector<8x8x128xf32>,
    } else {
    }
    %c0 = arith.constant 0 : index
    %c0_2 = arith.constant 0 : index
    %4 = vector.load %arg1[%c0, %c0_2] : memref<16x128xf32, #tpu.memory_space<vmem>>, vector<16x128xf32>
    %c0_3 = arith.constant 0 : index
    %c0_4 = arith.constant 0 : index
    %5 = vector.load %arg2[%c0_3, %c0_4] : memref<16x128xf32, #tpu.memory_space<vmem>>, vector<16x128xf32>
    %6 = arith.subf %4, %5 : vector<16x128xf32>
    %7 = arith.mulf %6, %6 : vector<16x128xf32>
    %c0_5 = arith.constant 0 : index
    %c0_6 = arith.constant 0 : index
    %c0_7 = arith.constant 0 : index
    %8 = vector.load %arg4[%c0_5, %c0_6, %c0_7] : memref<8x8x128xf32, #tpu.memory_space<vmem>>, vector<1x8x128xf32>
    %9 = vector.shape_cast %8 : vector<1x8x128xf32> to vector<8x128xf32>
    %10 = vector.shape_cast %7 : vector<16x128xf32> to vector<2x8x128xf32>
    %cst = arith.constant dense<0.000000e+00> : vector<8x128xf32>
    %11 = vector.multi_reduction <add>, %10, %cst [0] : vector<2x8x128xf32> to vector<8x128xf32>
    %12 = arith.addf %9, %11 : vector<8x128xf32>
    %c0_8 = arith.constant 0 : index
    %c0_9 = arith.constant 0 : index
    %c0_10 = arith.constant 0 : index
    %13 = vector.load %arg4[%c0_8, %c0_9, %c0_10] : memref<8x8x128xf32, #tpu.memory_space<vmem>>, vector<1x8x128xf32>
    %14 = vector.shape_cast %13 : vector<1x8x128xf32> to vector<8x128xf32>
    %15 = vector.shape_cast %12 : vector<8x128xf32> to vector<1x8x128xf32>
    tpu.vector_store %arg4[%c0_8, %c0_9, %c0_10], %15 {strides = array<i32>} : memref<8x8x128xf32, #tpu.memory_space<vmem>>, vector<1x8x128xf32>,
    %16 = arith.extui %1 : i1 to i32
    %c0_i32_11 = arith.constant 0 : i32
    %17 = arith.cmpi ne, %16, %c0_i32_11 : i32
    scf.if %17 {
      %c0_12 = arith.constant 0 : index
      %c0_13 = arith.constant 0 : index
      %c0_14 = arith.constant 0 : index
      %18 = vector.load %arg4[%c0_12, %c0_13, %c0_14] : memref<8x8x128xf32, #tpu.memory_space<vmem>>, vector<8x8x128xf32>
      %19 = vector.shape_cast %18 : vector<8x8x128xf32> to vector<1x8x8x128xf32>
      %cst_15 = arith.constant dense<0.000000e+00> : vector<1xf32>
      %20 = vector.multi_reduction <add>, %19, %cst_15 [1, 2, 3] : vector<1x8x8x128xf32> to vector<1xf32>
      %21 = vector.shape_cast %20 : vector<1xf32> to vector<1x1x1x1xf32>
      %22 = vector.extract %21[0, 0, 0, 0] : f32 from vector<1x1x1x1xf32>
      %cst_16 = arith.constant 4.8828125E-4 : f32
      %23 = arith.mulf %22, %cst_16 : f32
      %24 = vector.broadcast %23 : f32 to vector<8x128xf32>
      %c0_17 = arith.constant 0 : index
      %c0_18 = arith.constant 0 : index
      %25 = vector.load %arg3[%c0_17, %c0_18] : memref<8x128xf32, #tpu.memory_space<vmem>>, vector<8x128xf32>
      tpu.vector_store %arg3[%c0_17, %c0_18], %24 {strides = array<i32>} : memref<8x128xf32, #tpu.memory_space<vmem>>, vector<8x128xf32>,
    } else {
    }
    return
  }
  func.func @transform_0(%arg0: i32) -> (i32, i32) {
    %c0_i32 = arith.constant 0 : i32
    %c0_i32_0 = arith.constant 0 : i32
    return %arg0, %c0_i32 : i32, i32
  }
  func.func @transform_1(%arg0: i32) -> (i32, i32) {
    %c0_i32 = arith.constant 0 : i32
    %c0_i32_0 = arith.constant 0 : i32
    return %arg0, %c0_i32 : i32, i32
  }
  func.func @transform_2(%arg0: i32) -> (i32, i32) {
    %c0_i32 = arith.constant 0 : i32
    %c0_i32_0 = arith.constant 0 : i32
    %c0_i32_1 = arith.constant 0 : i32
    return %c0_i32, %c0_i32_0 : i32, i32
  }
}

</mosaic_0001>

<bundles_post_ra>
// kernel: tpu_custom_call.1
= control target key start
LH: loop header
LB: loop body
LE: loop exit
PB: predicated region body
PF: predicated region fallthrough
CT: control target
= control target key end

     0   :  { %7 = vsyncpa [#allocation4], 0  ;;  %s245_s0 = inlined_call_operand.hbm [shape: f32[16,128], index: 0, kind: input, shape index: {}]   ;;  %s246_s1 = inlined_call_operand.hbm [shape: f32[16,128], index: 1, kind: input, shape index: {}]   ;;  %s247_s2 = inlined_call_operand.hbm [shape: f32[8,128], index: 2, kind: output, shape index: {}]  }
   0x1   :  { %8 = vsyncpa [#allocation7], 0 }
   0x2   :  { %9 = vsyncpa [#allocation5], 0  ;;  %s189_s9 = smov [#allocation3]   ;;  %s117_s13 = scalar_lea.hbm %s245_s0, 256 }
   0x3   :  { %s15_s10 = sshll.u32 %s189_s9, 4  ;;  %p118_p0 = scmp.ne.s32.totalorder %s245_s0, %s117_s13  ;;  %s16_s10 = int_to_ptr.vmem [resolvable:$true] %s15_s10 }
   0x4   :  { %p121_p1 = scmp.lt.u32.totalorder %s117_s13, %s245_s0 }
   0x6   :  { %p123_p2 = pnand %p121_p1, %p118_p0 }
   0x8   :  { %126 = shalt.err (!%p123_p2)
}
   0x9   :  { %s127_s18 = scalar_lea.vmem %s16_s10, 256  ;;  %p132_p4 = scmp.lt.s32.totalorder %s16_s10, %s16_s10 }
   0xa   :  { %p128_p3 = scmp.ne.s32.totalorder %s16_s10, %s127_s18  ;;  %p133_p5 = scmp.lt.s32.totalorder %s127_s18, %s127_s18 }
   0xc   :  { %p134_p6 = por %p133_p5, %p132_p4 }
   0xe   :  { %p135_p7 = pnand %p134_p6, %p128_p3 }
  0x10   :  { %138 = shalt.err (!%p135_p7)
}
  0x11   :  { %s190_s19 = smov 128   ;;  %s191_s20 = smov 8  }
  0x12   :  { %21 = dma.hbm_to_vmem [thread:$0]  %s245_s0, 256, %s16_s10, [#allocation4], %s190_s19, %s190_s19, %s191_s20  }
  0x13   :  { %s192_s23 = smov [#allocation6]   ;;  %s139_s27 = scalar_lea.hbm %s246_s1, 256 }
  0x14   :  { %s27_s24 = sshll.u32 %s192_s23, 4  ;;  %p140_p8 = scmp.ne.s32.totalorder %s246_s1, %s139_s27  ;;  %s28_s24 = int_to_ptr.vmem [resolvable:$true] %s27_s24 }
  0x15   :  { %p143_p9 = scmp.lt.u32.totalorder %s139_s27, %s246_s1 }
  0x17   :  { %p145_p10 = pnand %p143_p9, %p140_p8 }
  0x19   :  { %148 = shalt.err (!%p145_p10)
}
  0x1a   :  { %s149_s4 = scalar_lea.vmem %s28_s24, 256  ;;  %p154_p12 = scmp.lt.s32.totalorder %s28_s24, %s28_s24 }
  0x1b   :  { %p150_p11 = scmp.ne.s32.totalorder %s28_s24, %s149_s4  ;;  %p155_p13 = scmp.lt.s32.totalorder %s149_s4, %s149_s4 }
  0x1d   :  { %p156_p0 = por %p155_p13, %p154_p12 }
  0x1f   :  { %p157_p1 = pnand %p156_p0, %p150_p11 }
  0x21   :  { %160 = shalt.err (!%p157_p1)
}
  0x22   :  { %33 = dma.hbm_to_vmem [thread:$0]  %s246_s1, 256, %s28_s24, [#allocation7], %s190_s19, %s190_s19, %s191_s20  }
  0x23   :  { %183 = dma.done.wait [#allocation4], 256  }
  0x24   :  { %184 = vsyncadd [#allocation4], 4294967040 }
  0x25   :  { %185 = dma.done.wait [#allocation7], 256  }
  0x26   :  { %186 = vsyncadd [#allocation7], 4294967040  ;;  %v52_v0 = vld [vmem:[#allocation3] sm:$0xff]  ;;  %v53_v1 = vld [vmem:[#allocation3 + $0x8] sm:$0xff]  ;;  %s193_s1 = smov [#allocation8]  }
  0x27   :  { %v54_v2 = vld [vmem:[#allocation6] sm:$0xff]  ;;  %v55_v3 = vld [vmem:[#allocation6 + $0x8] sm:$0xff]  ;;  %s100_s6 = sshll.u32 %s193_s1, 4  ;;  %s101_s6 = int_to_ptr.vmem [resolvable:$true] %s100_s6 }
  0x28   :  { %v56_v4 = vsub.f32 %v52_v0, %v54_v2  ;;  %v57_v5 = vsub.f32 %v53_v1, %v55_v3  ;;  %s161_s9 = scalar_lea.vmem %s101_s6, 128  ;;  %p166_p3 = scmp.lt.s32.totalorder %s101_s6, %s101_s6 }
  0x29   :  { %p162_p2 = scmp.ne.s32.totalorder %s101_s6, %s161_s9  ;;  %p167_p4 = scmp.lt.s32.totalorder %s161_s9, %s161_s9 }
  0x2a   :  { %v58_v6 = vmul.f32 %v56_v4, %v56_v4  ;;  %v59_v7 = vmul.f32 %v57_v5, %v57_v5 }
  0x2b   :  { %p168_p5 = por %p167_p4, %p166_p3 }
  0x2c   :  { %v61_v8 = vadd.f32 %v59_v7, %v58_v6 }
  0x2d   :  { %p169_p6 = pnand %p168_p5, %p162_p2 }
  0x2e   :  { %82 = vadd.xlane.f32.xlu0 %v61_v8 }
  0xbb   :  { %v83_v9 = vpop.xlane.xlu0 %82 }
  0xbc   :  { %v84_v10 = vrot.slane %v83_v9, 4 }
  0xbe   :  { %v85_v11 = vadd.f32 %v84_v10, %v83_v9 }
  0xc0   :  { %v86_v12 = vrot.slane %v85_v11, 2 }
  0xc2   :  { %v87_v13 = vadd.f32 %v86_v12, %v85_v11 }
  0xc4   :  { %v88_v14 = vrot.slane %v87_v13, 1 }
  0xc6   :  { %v89_v15 = vadd.f32 %v88_v14, %v87_v13 }
  0xc8   :  { %110 = vpush %v89_v15 }
  0xf9   :  { %s111_s7 = spop %110 }
  0xfa   :  { %s91_s8 = smul.f32 0.00048828125, %s111_s7 }
  0xfc   :  { %v92_v16 = vstv %s91_s8 }
  0xfd   :  { %93 = vst [vmem:[#allocation8] sm:$0xff] %v92_v16 }
  0xfe   :  { %172 = shalt.err (!%p169_p6)
}
  0xff   :  { %s173_s12 = scalar_lea.hbm %s247_s2, 128 }
 0x100   :  { %p174_p7 = scmp.ne.s32.totalorder %s247_s2, %s173_s12  ;;  %p177_p8 = scmp.lt.u32.totalorder %s173_s12, %s247_s2 }
 0x102   :  { %p179_p9 = pnand %p177_p8, %p174_p7 }
 0x104   :  { %182 = shalt.err (!%p179_p9)
}
 0x105   :  { %103 = dma.vmem_to_hbm [thread:$0]  %s101_s6, 128, %s247_s2, [#allocation5]  }
 0x106   :  { %187 = dma.done.wait [#allocation5], 128  }
 0x107   :  { %188 = vsyncadd [#allocation5], 4294967168 }
 0x108   :  { %107 = vsyncpa [#allocation4], 1 }
 0x109   :  { %108 = vsyncpa [#allocation7], 1 }
 0x10a   :  { %109 = vsyncpa [#allocation5], 1 }

</bundles_post_ra>
